<compile_context>
chip_gen: v7x
topology: tpu7x:2x2x1
jax: 0.10.0
libtpu: 0.0.40
codegen_flags: <defaults>
</compile_context>

<pallas_src>
import jax
import jax.numpy as jnp
from jax.experimental import pallas as pl
from jax.experimental.pallas import tpu as pltpu


_WINDOW = 8  # DMA ring depth (semaphores per table); b_tile is a multiple of this.


def _round_up(x, m):
    return ((x + m - 1) // m) * m


def glove_gather_kernel(center_ref, k_ref,        # SMEM scalar-prefetch indices (b_pad,)
                        ftab_hbm, ctab_hbm,       # HBM embedding tables (V, E)
                        fout_ref, cout_ref,       # VMEM output tiles (b_tile, E)
                        fsem, csem):              # DMA semaphore rings (_WINDOW,)
    b_tile = fout_ref.shape[0]
    n_win = b_tile // _WINDOW
    base = pl.program_id(0) * b_tile

    def read_idx(r):
        # Scalar reads from SMEM (dynamic index into the prefetched arrays).
        return center_ref[base + r], k_ref[base + r]

    def start_row(r, c_idx, k_idx, slot):
        # Gather one table row per index straight into the output block.
        pltpu.make_async_copy(ftab_hbm.at[pl.ds(c_idx, 1), :],
                              fout_ref.at[pl.ds(r, 1), :],
                              fsem.at[slot]).start()
        pltpu.make_async_copy(ctab_hbm.at[pl.ds(k_idx, 1), :],
                              cout_ref.at[pl.ds(r, 1), :],
                              csem.at[slot]).start()

    def wait_row(r, slot):
        # Only the dst shape and the semaphore matter for .wait().
        pltpu.make_async_copy(ftab_hbm.at[pl.ds(0, 1), :],
                              fout_ref.at[pl.ds(r, 1), :],
                              fsem.at[slot]).wait()
        pltpu.make_async_copy(ctab_hbm.at[pl.ds(0, 1), :],
                              cout_ref.at[pl.ds(r, 1), :],
                              csem.at[slot]).wait()

    # Prime the ring: _WINDOW rows per table in flight before the first wait.
    for j in range(_WINDOW):
        c_idx, k_idx = read_idx(j)
        start_row(j, c_idx, k_idx, j)

    # Steady state: wait on the oldest row in slot j and immediately refill the
    # slot with the row one window ahead (static 8-wide unroll per iteration,
    # bounded traced loop over windows -- no 2*b_tile descriptor blow-up).
    if n_win > 1:
        @pl.loop(1, n_win)
        def _steady(w):
            prev = (w - 1) * _WINDOW
            for j in range(_WINDOW):
                nxt = prev + _WINDOW + j
                c_idx, k_idx = read_idx(nxt)   # scalar reads before the wait
                wait_row(prev + j, j)
                start_row(nxt, c_idx, k_idx, j)

    # Drain the final window.
    last = (n_win - 1) * _WINDOW
    for j in range(_WINDOW):
        wait_row(last + j, j)


def glove_forward(center, k, focal_emb, context_emb, focal_bias, context_bias,
                  *, b_tile=None):
    """Pallas implementation of GloVeModel.forward(center, k)."""
    B = center.shape[0]
    V, E = focal_emb.shape

    if b_tile is None:
        # ~half the batch per tile (>= 2 tiles feed both v7x TensorCores once B
        # is big enough), capped at 256 rows; sublane / ring aligned.
        half = _round_up(max(1, (B + 1) // 2), _WINDOW)
        b_tile = min(256, half)
    b_tile = max(_WINDOW, _round_up(b_tile, _WINDOW))
    b_pad = _round_up(B, b_tile)
    nb = b_pad // b_tile

    def prep_idx(idx):
        # Clamp (PyTorch raises on OOB; we must not issue unchecked HBM reads)
        # and pad the batch; padded rows gather a valid row and are sliced off.
        idx = jnp.clip(idx.astype(jnp.int32), 0, V - 1)
        return jnp.pad(idx, (0, b_pad - B))

    center_i = prep_idx(center)
    k_i = prep_idx(k)

    grid_spec = pltpu.PrefetchScalarGridSpec(
        num_scalar_prefetch=2,                            # center, k -> SMEM
        grid=(nb,),
        in_specs=[pl.BlockSpec(memory_space=pl.ANY),      # tables stay in HBM
                  pl.BlockSpec(memory_space=pl.ANY)],
        out_specs=[pl.BlockSpec((b_tile, E), lambda i, c, kk: (i, 0)),
                   pl.BlockSpec((b_tile, E), lambda i, c, kk: (i, 0))],
        scratch_shapes=[pltpu.SemaphoreType.DMA((_WINDOW,)),
                        pltpu.SemaphoreType.DMA((_WINDOW,))],
    )

    fout, cout = pl.pallas_call(
        glove_gather_kernel,
        out_shape=(jax.ShapeDtypeStruct((b_pad, E), focal_emb.dtype),
                   jax.ShapeDtypeStruct((b_pad, E), context_emb.dtype)),
        grid_spec=grid_spec,
        compiler_params=pltpu.CompilerParams(
            dimension_semantics=("parallel",)),           # batch tiles across TCs (v7x)
    )(center_i, k_i, focal_emb, context_emb)

    focal_embed = fout[:B]
    context_embed = cout[:B]

    # (V, 1) bias tables are tiny; a plain take in the wrapper beats per-row
    # (1, 1) DMAs / lane-width-1 stores inside the kernel (perf review).
    c_safe = jnp.clip(center.astype(jnp.int32), 0, V - 1)
    k_safe = jnp.clip(k.astype(jnp.int32), 0, V - 1)
    focal_bias_out = jnp.take(focal_bias, c_safe, axis=0)
    context_bias_out = jnp.take(context_bias, k_safe, axis=0)
    return focal_embed, context_embed, focal_bias_out, context_bias_out


if __name__ == "__main__":
    # Small, deterministic configuration consistent with the module's __init__.
    vocab_size = 64
    embedding_size = 32
    batch = 8

    key = jax.random.PRNGKey(0)
    k_fe, k_ce, k_fb, k_cb, k_center, k_ctx = jax.random.split(key, 6)

    # nn.Embedding default init: N(0, 1).
    focal_emb = jax.random.normal(k_fe, (vocab_size, embedding_size), jnp.float32)
    context_emb = jax.random.normal(k_ce, (vocab_size, embedding_size), jnp.float32)
    focal_bias = jax.random.normal(k_fb, (vocab_size, 1), jnp.float32)
    context_bias = jax.random.normal(k_cb, (vocab_size, 1), jnp.float32)

    center = jax.random.randint(k_center, (batch,), 0, vocab_size, jnp.int32)
    kk = jax.random.randint(k_ctx, (batch,), 0, vocab_size, jnp.int32)

    fe, ce, fb, cb = glove_forward(center, kk, focal_emb, context_emb,
                                   focal_bias, context_bias)
    jax.block_until_ready((fe, ce, fb, cb))

    # Pure-JAX reference (embedding lookups).
    fe_ref = jnp.take(focal_emb, center, axis=0)
    ce_ref = jnp.take(context_emb, kk, axis=0)
    fb_ref = jnp.take(focal_bias, center, axis=0)
    cb_ref = jnp.take(context_bias, kk, axis=0)

    assert fe.shape == (batch, embedding_size) and fb.shape == (batch, 1)
    assert ce.shape == (batch, embedding_size) and cb.shape == (batch, 1)
    assert jnp.allclose(fe, fe_ref, atol=1e-6)
    assert jnp.allclose(ce, ce_ref, atol=1e-6)
    assert jnp.allclose(fb, fb_ref, atol=1e-6)
    assert jnp.allclose(cb, cb_ref, atol=1e-6)

    print("KERNEL_OK")
</pallas_src>

<mosaic_0001>
module attributes {stable_mosaic.version = 11 : i64} {
  func.func @glove_gather_kernel(%arg0: i32, %arg1: memref<8xi32, #tpu.memory_space<smem>>, %arg2: memref<8xi32, #tpu.memory_space<smem>>, %arg3: memref<64x32xf32, #tpu.memory_space<any>>, %arg4: memref<64x32xf32, #tpu.memory_space<any>>, %arg5: memref<8x32xf32, #tpu.memory_space<vmem>>, %arg6: memref<8x32xf32, #tpu.memory_space<vmem>>, %arg7: memref<8x!tpu.dma_semaphore, #tpu.memory_space<semaphore_mem>>, %arg8: memref<8x!tpu.dma_semaphore, #tpu.memory_space<semaphore_mem>>) attributes {dimension_semantics = [#tpu.dimension_semantics<parallel>], iteration_bounds = array<i64: 1>, scalar_prefetch = 2 : i64, scratch_operands = 2 : i64, tpu.core_type = #tpu.core_type<tc>, window_params = [{}, {}, {transform_indices = @transform_2, window_bounds = array<i64: 8, 32>}, {transform_indices = @transform_3, window_bounds = array<i64: 8, 32>}]} {
    %c8_i32 = arith.constant 8 : i32
    %0 = arith.muli %arg0, %c8_i32 : i32
    %c0_i32 = arith.constant 0 : i32
    %1 = arith.addi %0, %c0_i32 : i32
    %2 = arith.index_cast %1 : i32 to index
    %3 = memref.load %arg1[%2] : memref<8xi32, #tpu.memory_space<smem>>
    %c0_i32_0 = arith.constant 0 : i32
    %4 = arith.addi %0, %c0_i32_0 : i32
    %5 = arith.index_cast %4 : i32 to index
    %6 = memref.load %arg2[%5] : memref<8xi32, #tpu.memory_space<smem>>
    %c0_i32_1 = arith.constant 0 : i32
    %c0_i32_2 = arith.constant 0 : i32
    %7 = tpu.memref_slice %arg3[%3, %c0_i32_2] : memref<64x32xf32, #tpu.memory_space<any>> -> memref<1x32xf32, #tpu.memory_space<any>>
    %c0_i32_3 = arith.constant 0 : i32
    %c0_i32_4 = arith.constant 0 : i32
    %8 = tpu.memref_slice %arg5[%c0_i32_3, %c0_i32_4] : memref<8x32xf32, #tpu.memory_space<vmem>> -> memref<1x32xf32, #tpu.memory_space<vmem>>
    %9 = tpu.memref_slice %arg7[%c0_i32_1] : memref<8x!tpu.dma_semaphore, #tpu.memory_space<semaphore_mem>> -> memref<1x!tpu.dma_semaphore, #tpu.memory_space<semaphore_mem>>
    %10 = tpu.memref_squeeze %9 : memref<1x!tpu.dma_semaphore, #tpu.memory_space<semaphore_mem>> -> memref<!tpu.dma_semaphore, #tpu.memory_space<semaphore_mem>>
    tpu.enqueue_dma source(%7 : memref<1x32xf32, #tpu.memory_space<any>>) target(%8 : memref<1x32xf32, #tpu.memory_space<vmem>>) target_semaphore(%10 : memref<!tpu.dma_semaphore, #tpu.memory_space<semaphore_mem>>)
    %c0_i32_5 = arith.constant 0 : i32
    %c0_i32_6 = arith.constant 0 : i32
    %11 = tpu.memref_slice %arg4[%6, %c0_i32_6] : memref<64x32xf32, #tpu.memory_space<any>> -> memref<1x32xf32, #tpu.memory_space<any>>
    %c0_i32_7 = arith.constant 0 : i32
    %c0_i32_8 = arith.constant 0 : i32
    %12 = tpu.memref_slice %arg6[%c0_i32_7, %c0_i32_8] : memref<8x32xf32, #tpu.memory_space<vmem>> -> memref<1x32xf32, #tpu.memory_space<vmem>>
    %13 = tpu.memref_slice %arg8[%c0_i32_5] : memref<8x!tpu.dma_semaphore, #tpu.memory_space<semaphore_mem>> -> memref<1x!tpu.dma_semaphore, #tpu.memory_space<semaphore_mem>>
    %14 = tpu.memref_squeeze %13 : memref<1x!tpu.dma_semaphore, #tpu.memory_space<semaphore_mem>> -> memref<!tpu.dma_semaphore, #tpu.memory_space<semaphore_mem>>
    tpu.enqueue_dma source(%11 : memref<1x32xf32, #tpu.memory_space<any>>) target(%12 : memref<1x32xf32, #tpu.memory_space<vmem>>) target_semaphore(%14 : memref<!tpu.dma_semaphore, #tpu.memory_space<semaphore_mem>>)
    %c1_i32 = arith.constant 1 : i32
    %15 = arith.addi %0, %c1_i32 : i32
    %16 = arith.index_cast %15 : i32 to index
    %17 = memref.load %arg1[%16] : memref<8xi32, #tpu.memory_space<smem>>
    %c1_i32_9 = arith.constant 1 : i32
    %18 = arith.addi %0, %c1_i32_9 : i32
    %19 = arith.index_cast %18 : i32 to index
    %20 = memref.load %arg2[%19] : memref<8xi32, #tpu.memory_space<smem>>
    %c1_i32_10 = arith.constant 1 : i32
    %c0_i32_11 = arith.constant 0 : i32
    %21 = tpu.memref_slice %arg3[%17, %c0_i32_11] : memref<64x32xf32, #tpu.memory_space<any>> -> memref<1x32xf32, #tpu.memory_space<any>>
    %c1_i32_12 = arith.constant 1 : i32
    %c0_i32_13 = arith.constant 0 : i32
    %22 = tpu.memref_slice %arg5[%c1_i32_12, %c0_i32_13] : memref<8x32xf32, #tpu.memory_space<vmem>> -> memref<1x32xf32, #tpu.memory_space<vmem>>
    %23 = tpu.memref_slice %arg7[%c1_i32_10] : memref<8x!tpu.dma_semaphore, #tpu.memory_space<semaphore_mem>> -> memref<1x!tpu.dma_semaphore, #tpu.memory_space<semaphore_mem>>
    %24 = tpu.memref_squeeze %23 : memref<1x!tpu.dma_semaphore, #tpu.memory_space<semaphore_mem>> -> memref<!tpu.dma_semaphore, #tpu.memory_space<semaphore_mem>>
    tpu.enqueue_dma source(%21 : memref<1x32xf32, #tpu.memory_space<any>>) target(%22 : memref<1x32xf32, #tpu.memory_space<vmem>>) target_semaphore(%24 : memref<!tpu.dma_semaphore, #tpu.memory_space<semaphore_mem>>)
    %c1_i32_14 = arith.constant 1 : i32
    %c0_i32_15 = arith.constant 0 : i32
    %25 = tpu.memref_slice %arg4[%20, %c0_i32_15] : memref<64x32xf32, #tpu.memory_space<any>> -> memref<1x32xf32, #tpu.memory_space<any>>
    %c1_i32_16 = arith.constant 1 : i32
    %c0_i32_17 = arith.constant 0 : i32
    %26 = tpu.memref_slice %arg6[%c1_i32_16, %c0_i32_17] : memref<8x32xf32, #tpu.memory_space<vmem>> -> memref<1x32xf32, #tpu.memory_space<vmem>>
    %27 = tpu.memref_slice %arg8[%c1_i32_14] : memref<8x!tpu.dma_semaphore, #tpu.memory_space<semaphore_mem>> -> memref<1x!tpu.dma_semaphore, #tpu.memory_space<semaphore_mem>>
    %28 = tpu.memref_squeeze %27 : memref<1x!tpu.dma_semaphore, #tpu.memory_space<semaphore_mem>> -> memref<!tpu.dma_semaphore, #tpu.memory_space<semaphore_mem>>
    tpu.enqueue_dma source(%25 : memref<1x32xf32, #tpu.memory_space<any>>) target(%26 : memref<1x32xf32, #tpu.memory_space<vmem>>) target_semaphore(%28 : memref<!tpu.dma_semaphore, #tpu.memory_space<semaphore_mem>>)
    %c2_i32 = arith.constant 2 : i32
    %29 = arith.addi %0, %c2_i32 : i32
    %30 = arith.index_cast %29 : i32 to index
    %31 = memref.load %arg1[%30] : memref<8xi32, #tpu.memory_space<smem>>
    %c2_i32_18 = arith.constant 2 : i32
    %32 = arith.addi %0, %c2_i32_18 : i32
    %33 = arith.index_cast %32 : i32 to index
    %34 = memref.load %arg2[%33] : memref<8xi32, #tpu.memory_space<smem>>
    %c2_i32_19 = arith.constant 2 : i32
    %c0_i32_20 = arith.constant 0 : i32
    %35 = tpu.memref_slice %arg3[%31, %c0_i32_20] : memref<64x32xf32, #tpu.memory_space<any>> -> memref<1x32xf32, #tpu.memory_space<any>>
    %c2_i32_21 = arith.constant 2 : i32
    %c0_i32_22 = arith.constant 0 : i32
    %36 = tpu.memref_slice %arg5[%c2_i32_21, %c0_i32_22] : memref<8x32xf32, #tpu.memory_space<vmem>> -> memref<1x32xf32, #tpu.memory_space<vmem>>
    %37 = tpu.memref_slice %arg7[%c2_i32_19] : memref<8x!tpu.dma_semaphore, #tpu.memory_space<semaphore_mem>> -> memref<1x!tpu.dma_semaphore, #tpu.memory_space<semaphore_mem>>
    %38 = tpu.memref_squeeze %37 : memref<1x!tpu.dma_semaphore, #tpu.memory_space<semaphore_mem>> -> memref<!tpu.dma_semaphore, #tpu.memory_space<semaphore_mem>>
    tpu.enqueue_dma source(%35 : memref<1x32xf32, #tpu.memory_space<any>>) target(%36 : memref<1x32xf32, #tpu.memory_space<vmem>>) target_semaphore(%38 : memref<!tpu.dma_semaphore, #tpu.memory_space<semaphore_mem>>)
    %c2_i32_23 = arith.constant 2 : i32
    %c0_i32_24 = arith.constant 0 : i32
    %39 = tpu.memref_slice %arg4[%34, %c0_i32_24] : memref<64x32xf32, #tpu.memory_space<any>> -> memref<1x32xf32, #tpu.memory_space<any>>
    %c2_i32_25 = arith.constant 2 : i32
    %c0_i32_26 = arith.constant 0 : i32
    %40 = tpu.memref_slice %arg6[%c2_i32_25, %c0_i32_26] : memref<8x32xf32, #tpu.memory_space<vmem>> -> memref<1x32xf32, #tpu.memory_space<vmem>>
    %41 = tpu.memref_slice %arg8[%c2_i32_23] : memref<8x!tpu.dma_semaphore, #tpu.memory_space<semaphore_mem>> -> memref<1x!tpu.dma_semaphore, #tpu.memory_space<semaphore_mem>>
    %42 = tpu.memref_squeeze %41 : memref<1x!tpu.dma_semaphore, #tpu.memory_space<semaphore_mem>> -> memref<!tpu.dma_semaphore, #tpu.memory_space<semaphore_mem>>
    tpu.enqueue_dma source(%39 : memref<1x32xf32, #tpu.memory_space<any>>) target(%40 : memref<1x32xf32, #tpu.memory_space<vmem>>) target_semaphore(%42 : memref<!tpu.dma_semaphore, #tpu.memory_space<semaphore_mem>>)
    %c3_i32 = arith.constant 3 : i32
    %43 = arith.addi %0, %c3_i32 : i32
    %44 = arith.index_cast %43 : i32 to index
    %45 = memref.load %arg1[%44] : memref<8xi32, #tpu.memory_space<smem>>
    %c3_i32_27 = arith.constant 3 : i32
    %46 = arith.addi %0, %c3_i32_27 : i32
    %47 = arith.index_cast %46 : i32 to index
    %48 = memref.load %arg2[%47] : memref<8xi32, #tpu.memory_space<smem>>
    %c3_i32_28 = arith.constant 3 : i32
    %c0_i32_29 = arith.constant 0 : i32
    %49 = tpu.memref_slice %arg3[%45, %c0_i32_29] : memref<64x32xf32, #tpu.memory_space<any>> -> memref<1x32xf32, #tpu.memory_space<any>>
    %c3_i32_30 = arith.constant 3 : i32
    %c0_i32_31 = arith.constant 0 : i32
    %50 = tpu.memref_slice %arg5[%c3_i32_30, %c0_i32_31] : memref<8x32xf32, #tpu.memory_space<vmem>> -> memref<1x32xf32, #tpu.memory_space<vmem>>
    %51 = tpu.memref_slice %arg7[%c3_i32_28] : memref<8x!tpu.dma_semaphore, #tpu.memory_space<semaphore_mem>> -> memref<1x!tpu.dma_semaphore, #tpu.memory_space<semaphore_mem>>
    %52 = tpu.memref_squeeze %51 : memref<1x!tpu.dma_semaphore, #tpu.memory_space<semaphore_mem>> -> memref<!tpu.dma_semaphore, #tpu.memory_space<semaphore_mem>>
    tpu.enqueue_dma source(%49 : memref<1x32xf32, #tpu.memory_space<any>>) target(%50 : memref<1x32xf32, #tpu.memory_space<vmem>>) target_semaphore(%52 : memref<!tpu.dma_semaphore, #tpu.memory_space<semaphore_mem>>)
    %c3_i32_32 = arith.constant 3 : i32
    %c0_i32_33 = arith.constant 0 : i32
    %53 = tpu.memref_slice %arg4[%48, %c0_i32_33] : memref<64x32xf32, #tpu.memory_space<any>> -> memref<1x32xf32, #tpu.memory_space<any>>
    %c3_i32_34 = arith.constant 3 : i32
    %c0_i32_35 = arith.constant 0 : i32
    %54 = tpu.memref_slice %arg6[%c3_i32_34, %c0_i32_35] : memref<8x32xf32, #tpu.memory_space<vmem>> -> memref<1x32xf32, #tpu.memory_space<vmem>>
    %55 = tpu.memref_slice %arg8[%c3_i32_32] : memref<8x!tpu.dma_semaphore, #tpu.memory_space<semaphore_mem>> -> memref<1x!tpu.dma_semaphore, #tpu.memory_space<semaphore_mem>>
    %56 = tpu.memref_squeeze %55 : memref<1x!tpu.dma_semaphore, #tpu.memory_space<semaphore_mem>> -> memref<!tpu.dma_semaphore, #tpu.memory_space<semaphore_mem>>
    tpu.enqueue_dma source(%53 : memref<1x32xf32, #tpu.memory_space<any>>) target(%54 : memref<1x32xf32, #tpu.memory_space<vmem>>) target_semaphore(%56 : memref<!tpu.dma_semaphore, #tpu.memory_space<semaphore_mem>>)
    %c4_i32 = arith.constant 4 : i32
    %57 = arith.addi %0, %c4_i32 : i32
    %58 = arith.index_cast %57 : i32 to index
    %59 = memref.load %arg1[%58] : memref<8xi32, #tpu.memory_space<smem>>
    %c4_i32_36 = arith.constant 4 : i32
    %60 = arith.addi %0, %c4_i32_36 : i32
    %61 = arith.index_cast %60 : i32 to index
    %62 = memref.load %arg2[%61] : memref<8xi32, #tpu.memory_space<smem>>
    %c4_i32_37 = arith.constant 4 : i32
    %c0_i32_38 = arith.constant 0 : i32
    %63 = tpu.memref_slice %arg3[%59, %c0_i32_38] : memref<64x32xf32, #tpu.memory_space<any>> -> memref<1x32xf32, #tpu.memory_space<any>>
    %c4_i32_39 = arith.constant 4 : i32
    %c0_i32_40 = arith.constant 0 : i32
    %64 = tpu.memref_slice %arg5[%c4_i32_39, %c0_i32_40] : memref<8x32xf32, #tpu.memory_space<vmem>> -> memref<1x32xf32, #tpu.memory_space<vmem>>
    %65 = tpu.memref_slice %arg7[%c4_i32_37] : memref<8x!tpu.dma_semaphore, #tpu.memory_space<semaphore_mem>> -> memref<1x!tpu.dma_semaphore, #tpu.memory_space<semaphore_mem>>
    %66 = tpu.memref_squeeze %65 : memref<1x!tpu.dma_semaphore, #tpu.memory_space<semaphore_mem>> -> memref<!tpu.dma_semaphore, #tpu.memory_space<semaphore_mem>>
    tpu.enqueue_dma source(%63 : memref<1x32xf32, #tpu.memory_space<any>>) target(%64 : memref<1x32xf32, #tpu.memory_space<vmem>>) target_semaphore(%66 : memref<!tpu.dma_semaphore, #tpu.memory_space<semaphore_mem>>)
    %c4_i32_41 = arith.constant 4 : i32
    %c0_i32_42 = arith.constant 0 : i32
    %67 = tpu.memref_slice %arg4[%62, %c0_i32_42] : memref<64x32xf32, #tpu.memory_space<any>> -> memref<1x32xf32, #tpu.memory_space<any>>
    %c4_i32_43 = arith.constant 4 : i32
    %c0_i32_44 = arith.constant 0 : i32
    %68 = tpu.memref_slice %arg6[%c4_i32_43, %c0_i32_44] : memref<8x32xf32, #tpu.memory_space<vmem>> -> memref<1x32xf32, #tpu.memory_space<vmem>>
    %69 = tpu.memref_slice %arg8[%c4_i32_41] : memref<8x!tpu.dma_semaphore, #tpu.memory_space<semaphore_mem>> -> memref<1x!tpu.dma_semaphore, #tpu.memory_space<semaphore_mem>>
    %70 = tpu.memref_squeeze %69 : memref<1x!tpu.dma_semaphore, #tpu.memory_space<semaphore_mem>> -> memref<!tpu.dma_semaphore, #tpu.memory_space<semaphore_mem>>
    tpu.enqueue_dma source(%67 : memref<1x32xf32, #tpu.memory_space<any>>) target(%68 : memref<1x32xf32, #tpu.memory_space<vmem>>) target_semaphore(%70 : memref<!tpu.dma_semaphore, #tpu.memory_space<semaphore_mem>>)
    %c5_i32 = arith.constant 5 : i32
    %71 = arith.addi %0, %c5_i32 : i32
    %72 = arith.index_cast %71 : i32 to index
    %73 = memref.load %arg1[%72] : memref<8xi32, #tpu.memory_space<smem>>
    %c5_i32_45 = arith.constant 5 : i32
    %74 = arith.addi %0, %c5_i32_45 : i32
    %75 = arith.index_cast %74 : i32 to index
    %76 = memref.load %arg2[%75] : memref<8xi32, #tpu.memory_space<smem>>
    %c5_i32_46 = arith.constant 5 : i32
    %c0_i32_47 = arith.constant 0 : i32
    %77 = tpu.memref_slice %arg3[%73, %c0_i32_47] : memref<64x32xf32, #tpu.memory_space<any>> -> memref<1x32xf32, #tpu.memory_space<any>>
    %c5_i32_48 = arith.constant 5 : i32
    %c0_i32_49 = arith.constant 0 : i32
    %78 = tpu.memref_slice %arg5[%c5_i32_48, %c0_i32_49] : memref<8x32xf32, #tpu.memory_space<vmem>> -> memref<1x32xf32, #tpu.memory_space<vmem>>
    %79 = tpu.memref_slice %arg7[%c5_i32_46] : memref<8x!tpu.dma_semaphore, #tpu.memory_space<semaphore_mem>> -> memref<1x!tpu.dma_semaphore, #tpu.memory_space<semaphore_mem>>
    %80 = tpu.memref_squeeze %79 : memref<1x!tpu.dma_semaphore, #tpu.memory_space<semaphore_mem>> -> memref<!tpu.dma_semaphore, #tpu.memory_space<semaphore_mem>>
    tpu.enqueue_dma source(%77 : memref<1x32xf32, #tpu.memory_space<any>>) target(%78 : memref<1x32xf32, #tpu.memory_space<vmem>>) target_semaphore(%80 : memref<!tpu.dma_semaphore, #tpu.memory_space<semaphore_mem>>)
    %c5_i32_50 = arith.constant 5 : i32
    %c0_i32_51 = arith.constant 0 : i32
    %81 = tpu.memref_slice %arg4[%76, %c0_i32_51] : memref<64x32xf32, #tpu.memory_space<any>> -> memref<1x32xf32, #tpu.memory_space<any>>
    %c5_i32_52 = arith.constant 5 : i32
    %c0_i32_53 = arith.constant 0 : i32
    %82 = tpu.memref_slice %arg6[%c5_i32_52, %c0_i32_53] : memref<8x32xf32, #tpu.memory_space<vmem>> -> memref<1x32xf32, #tpu.memory_space<vmem>>
    %83 = tpu.memref_slice %arg8[%c5_i32_50] : memref<8x!tpu.dma_semaphore, #tpu.memory_space<semaphore_mem>> -> memref<1x!tpu.dma_semaphore, #tpu.memory_space<semaphore_mem>>
    %84 = tpu.memref_squeeze %83 : memref<1x!tpu.dma_semaphore, #tpu.memory_space<semaphore_mem>> -> memref<!tpu.dma_semaphore, #tpu.memory_space<semaphore_mem>>
    tpu.enqueue_dma source(%81 : memref<1x32xf32, #tpu.memory_space<any>>) target(%82 : memref<1x32xf32, #tpu.memory_space<vmem>>) target_semaphore(%84 : memref<!tpu.dma_semaphore, #tpu.memory_space<semaphore_mem>>)
    %c6_i32 = arith.constant 6 : i32
    %85 = arith.addi %0, %c6_i32 : i32
    %86 = arith.index_cast %85 : i32 to index
    %87 = memref.load %arg1[%86] : memref<8xi32, #tpu.memory_space<smem>>
    %c6_i32_54 = arith.constant 6 : i32
    %88 = arith.addi %0, %c6_i32_54 : i32
    %89 = arith.index_cast %88 : i32 to index
    %90 = memref.load %arg2[%89] : memref<8xi32, #tpu.memory_space<smem>>
    %c6_i32_55 = arith.constant 6 : i32
    %c0_i32_56 = arith.constant 0 : i32
    %91 = tpu.memref_slice %arg3[%87, %c0_i32_56] : memref<64x32xf32, #tpu.memory_space<any>> -> memref<1x32xf32, #tpu.memory_space<any>>
    %c6_i32_57 = arith.constant 6 : i32
    %c0_i32_58 = arith.constant 0 : i32
    %92 = tpu.memref_slice %arg5[%c6_i32_57, %c0_i32_58] : memref<8x32xf32, #tpu.memory_space<vmem>> -> memref<1x32xf32, #tpu.memory_space<vmem>>
    %93 = tpu.memref_slice %arg7[%c6_i32_55] : memref<8x!tpu.dma_semaphore, #tpu.memory_space<semaphore_mem>> -> memref<1x!tpu.dma_semaphore, #tpu.memory_space<semaphore_mem>>
    %94 = tpu.memref_squeeze %93 : memref<1x!tpu.dma_semaphore, #tpu.memory_space<semaphore_mem>> -> memref<!tpu.dma_semaphore, #tpu.memory_space<semaphore_mem>>
    tpu.enqueue_dma source(%91 : memref<1x32xf32, #tpu.memory_space<any>>) target(%92 : memref<1x32xf32, #tpu.memory_space<vmem>>) target_semaphore(%94 : memref<!tpu.dma_semaphore, #tpu.memory_space<semaphore_mem>>)
    %c6_i32_59 = arith.constant 6 : i32
    %c0_i32_60 = arith.constant 0 : i32
    %95 = tpu.memref_slice %arg4[%90, %c0_i32_60] : memref<64x32xf32, #tpu.memory_space<any>> -> memref<1x32xf32, #tpu.memory_space<any>>
    %c6_i32_61 = arith.constant 6 : i32
    %c0_i32_62 = arith.constant 0 : i32
    %96 = tpu.memref_slice %arg6[%c6_i32_61, %c0_i32_62] : memref<8x32xf32, #tpu.memory_space<vmem>> -> memref<1x32xf32, #tpu.memory_space<vmem>>
    %97 = tpu.memref_slice %arg8[%c6_i32_59] : memref<8x!tpu.dma_semaphore, #tpu.memory_space<semaphore_mem>> -> memref<1x!tpu.dma_semaphore, #tpu.memory_space<semaphore_mem>>
    %98 = tpu.memref_squeeze %97 : memref<1x!tpu.dma_semaphore, #tpu.memory_space<semaphore_mem>> -> memref<!tpu.dma_semaphore, #tpu.memory_space<semaphore_mem>>
    tpu.enqueue_dma source(%95 : memref<1x32xf32, #tpu.memory_space<any>>) target(%96 : memref<1x32xf32, #tpu.memory_space<vmem>>) target_semaphore(%98 : memref<!tpu.dma_semaphore, #tpu.memory_space<semaphore_mem>>)
    %c7_i32 = arith.constant 7 : i32
    %99 = arith.addi %0, %c7_i32 : i32
    %100 = arith.index_cast %99 : i32 to index
    %101 = memref.load %arg1[%100] : memref<8xi32, #tpu.memory_space<smem>>
    %c7_i32_63 = arith.constant 7 : i32
    %102 = arith.addi %0, %c7_i32_63 : i32
    %103 = arith.index_cast %102 : i32 to index
    %104 = memref.load %arg2[%103] : memref<8xi32, #tpu.memory_space<smem>>
    %c7_i32_64 = arith.constant 7 : i32
    %c0_i32_65 = arith.constant 0 : i32
    %105 = tpu.memref_slice %arg3[%101, %c0_i32_65] : memref<64x32xf32, #tpu.memory_space<any>> -> memref<1x32xf32, #tpu.memory_space<any>>
    %c7_i32_66 = arith.constant 7 : i32
    %c0_i32_67 = arith.constant 0 : i32
    %106 = tpu.memref_slice %arg5[%c7_i32_66, %c0_i32_67] : memref<8x32xf32, #tpu.memory_space<vmem>> -> memref<1x32xf32, #tpu.memory_space<vmem>>
    %107 = tpu.memref_slice %arg7[%c7_i32_64] : memref<8x!tpu.dma_semaphore, #tpu.memory_space<semaphore_mem>> -> memref<1x!tpu.dma_semaphore, #tpu.memory_space<semaphore_mem>>
    %108 = tpu.memref_squeeze %107 : memref<1x!tpu.dma_semaphore, #tpu.memory_space<semaphore_mem>> -> memref<!tpu.dma_semaphore, #tpu.memory_space<semaphore_mem>>
    tpu.enqueue_dma source(%105 : memref<1x32xf32, #tpu.memory_space<any>>) target(%106 : memref<1x32xf32, #tpu.memory_space<vmem>>) target_semaphore(%108 : memref<!tpu.dma_semaphore, #tpu.memory_space<semaphore_mem>>)
    %c7_i32_68 = arith.constant 7 : i32
    %c0_i32_69 = arith.constant 0 : i32
    %109 = tpu.memref_slice %arg4[%104, %c0_i32_69] : memref<64x32xf32, #tpu.memory_space<any>> -> memref<1x32xf32, #tpu.memory_space<any>>
    %c7_i32_70 = arith.constant 7 : i32
    %c0_i32_71 = arith.constant 0 : i32
    %110 = tpu.memref_slice %arg6[%c7_i32_70, %c0_i32_71] : memref<8x32xf32, #tpu.memory_space<vmem>> -> memref<1x32xf32, #tpu.memory_space<vmem>>
    %111 = tpu.memref_slice %arg8[%c7_i32_68] : memref<8x!tpu.dma_semaphore, #tpu.memory_space<semaphore_mem>> -> memref<1x!tpu.dma_semaphore, #tpu.memory_space<semaphore_mem>>
    %112 = tpu.memref_squeeze %111 : memref<1x!tpu.dma_semaphore, #tpu.memory_space<semaphore_mem>> -> memref<!tpu.dma_semaphore, #tpu.memory_space<semaphore_mem>>
    tpu.enqueue_dma source(%109 : memref<1x32xf32, #tpu.memory_space<any>>) target(%110 : memref<1x32xf32, #tpu.memory_space<vmem>>) target_semaphore(%112 : memref<!tpu.dma_semaphore, #tpu.memory_space<semaphore_mem>>)
    %c0_i32_72 = arith.constant 0 : i32
    %c0_i32_73 = arith.constant 0 : i32
    %c0_i32_74 = arith.constant 0 : i32
    %113 = tpu.memref_slice %arg3[%c0_i32_73, %c0_i32_74] : memref<64x32xf32, #tpu.memory_space<any>> -> memref<1x32xf32, #tpu.memory_space<any>>
    %c0_i32_75 = arith.constant 0 : i32
    %c0_i32_76 = arith.constant 0 : i32
    %114 = tpu.memref_slice %arg5[%c0_i32_75, %c0_i32_76] : memref<8x32xf32, #tpu.memory_space<vmem>> -> memref<1x32xf32, #tpu.memory_space<vmem>>
    %115 = tpu.memref_slice %arg7[%c0_i32_72] : memref<8x!tpu.dma_semaphore, #tpu.memory_space<semaphore_mem>> -> memref<1x!tpu.dma_semaphore, #tpu.memory_space<semaphore_mem>>
    %116 = tpu.memref_squeeze %115 : memref<1x!tpu.dma_semaphore, #tpu.memory_space<semaphore_mem>> -> memref<!tpu.dma_semaphore, #tpu.memory_space<semaphore_mem>>
    tpu.wait_dma2 semaphore(%116 : memref<!tpu.dma_semaphore, #tpu.memory_space<semaphore_mem>>) src(%113 : memref<1x32xf32, #tpu.memory_space<any>>) dst(%114 : memref<1x32xf32, #tpu.memory_space<vmem>>)
    %c0_i32_77 = arith.constant 0 : i32
    %c0_i32_78 = arith.constant 0 : i32
    %c0_i32_79 = arith.constant 0 : i32
    %117 = tpu.memref_slice %arg4[%c0_i32_78, %c0_i32_79] : memref<64x32xf32, #tpu.memory_space<any>> -> memref<1x32xf32, #tpu.memory_space<any>>
    %c0_i32_80 = arith.constant 0 : i32
    %c0_i32_81 = arith.constant 0 : i32
    %118 = tpu.memref_slice %arg6[%c0_i32_80, %c0_i32_81] : memref<8x32xf32, #tpu.memory_space<vmem>> -> memref<1x32xf32, #tpu.memory_space<vmem>>
    %119 = tpu.memref_slice %arg8[%c0_i32_77] : memref<8x!tpu.dma_semaphore, #tpu.memory_space<semaphore_mem>> -> memref<1x!tpu.dma_semaphore, #tpu.memory_space<semaphore_mem>>
    %120 = tpu.memref_squeeze %119 : memref<1x!tpu.dma_semaphore, #tpu.memory_space<semaphore_mem>> -> memref<!tpu.dma_semaphore, #tpu.memory_space<semaphore_mem>>
    tpu.wait_dma2 semaphore(%120 : memref<!tpu.dma_semaphore, #tpu.memory_space<semaphore_mem>>) src(%117 : memref<1x32xf32, #tpu.memory_space<any>>) dst(%118 : memref<1x32xf32, #tpu.memory_space<vmem>>)
    %c1_i32_82 = arith.constant 1 : i32
    %c0_i32_83 = arith.constant 0 : i32
    %c0_i32_84 = arith.constant 0 : i32
    %121 = tpu.memref_slice %arg3[%c0_i32_83, %c0_i32_84] : memref<64x32xf32, #tpu.memory_space<any>> -> memref<1x32xf32, #tpu.memory_space<any>>
    %c1_i32_85 = arith.constant 1 : i32
    %c0_i32_86 = arith.constant 0 : i32
    %122 = tpu.memref_slice %arg5[%c1_i32_85, %c0_i32_86] : memref<8x32xf32, #tpu.memory_space<vmem>> -> memref<1x32xf32, #tpu.memory_space<vmem>>
    %123 = tpu.memref_slice %arg7[%c1_i32_82] : memref<8x!tpu.dma_semaphore, #tpu.memory_space<semaphore_mem>> -> memref<1x!tpu.dma_semaphore, #tpu.memory_space<semaphore_mem>>
    %124 = tpu.memref_squeeze %123 : memref<1x!tpu.dma_semaphore, #tpu.memory_space<semaphore_mem>> -> memref<!tpu.dma_semaphore, #tpu.memory_space<semaphore_mem>>
    tpu.wait_dma2 semaphore(%124 : memref<!tpu.dma_semaphore, #tpu.memory_space<semaphore_mem>>) src(%121 : memref<1x32xf32, #tpu.memory_space<any>>) dst(%122 : memref<1x32xf32, #tpu.memory_space<vmem>>)
    %c1_i32_87 = arith.constant 1 : i32
    %c0_i32_88 = arith.constant 0 : i32
    %c0_i32_89 = arith.constant 0 : i32
    %125 = tpu.memref_slice %arg4[%c0_i32_88, %c0_i32_89] : memref<64x32xf32, #tpu.memory_space<any>> -> memref<1x32xf32, #tpu.memory_space<any>>
    %c1_i32_90 = arith.constant 1 : i32
    %c0_i32_91 = arith.constant 0 : i32
    %126 = tpu.memref_slice %arg6[%c1_i32_90, %c0_i32_91] : memref<8x32xf32, #tpu.memory_space<vmem>> -> memref<1x32xf32, #tpu.memory_space<vmem>>
    %127 = tpu.memref_slice %arg8[%c1_i32_87] : memref<8x!tpu.dma_semaphore, #tpu.memory_space<semaphore_mem>> -> memref<1x!tpu.dma_semaphore, #tpu.memory_space<semaphore_mem>>
    %128 = tpu.memref_squeeze %127 : memref<1x!tpu.dma_semaphore, #tpu.memory_space<semaphore_mem>> -> memref<!tpu.dma_semaphore, #tpu.memory_space<semaphore_mem>>
    tpu.wait_dma2 semaphore(%128 : memref<!tpu.dma_semaphore, #tpu.memory_space<semaphore_mem>>) src(%125 : memref<1x32xf32, #tpu.memory_space<any>>) dst(%126 : memref<1x32xf32, #tpu.memory_space<vmem>>)
    %c2_i32_92 = arith.constant 2 : i32
    %c0_i32_93 = arith.constant 0 : i32
    %c0_i32_94 = arith.constant 0 : i32
    %129 = tpu.memref_slice %arg3[%c0_i32_93, %c0_i32_94] : memref<64x32xf32, #tpu.memory_space<any>> -> memref<1x32xf32, #tpu.memory_space<any>>
    %c2_i32_95 = arith.constant 2 : i32
    %c0_i32_96 = arith.constant 0 : i32
    %130 = tpu.memref_slice %arg5[%c2_i32_95, %c0_i32_96] : memref<8x32xf32, #tpu.memory_space<vmem>> -> memref<1x32xf32, #tpu.memory_space<vmem>>
    %131 = tpu.memref_slice %arg7[%c2_i32_92] : memref<8x!tpu.dma_semaphore, #tpu.memory_space<semaphore_mem>> -> memref<1x!tpu.dma_semaphore, #tpu.memory_space<semaphore_mem>>
    %132 = tpu.memref_squeeze %131 : memref<1x!tpu.dma_semaphore, #tpu.memory_space<semaphore_mem>> -> memref<!tpu.dma_semaphore, #tpu.memory_space<semaphore_mem>>
    tpu.wait_dma2 semaphore(%132 : memref<!tpu.dma_semaphore, #tpu.memory_space<semaphore_mem>>) src(%129 : memref<1x32xf32, #tpu.memory_space<any>>) dst(%130 : memref<1x32xf32, #tpu.memory_space<vmem>>)
    %c2_i32_97 = arith.constant 2 : i32
    %c0_i32_98 = arith.constant 0 : i32
    %c0_i32_99 = arith.constant 0 : i32
    %133 = tpu.memref_slice %arg4[%c0_i32_98, %c0_i32_99] : memref<64x32xf32, #tpu.memory_space<any>> -> memref<1x32xf32, #tpu.memory_space<any>>
    %c2_i32_100 = arith.constant 2 : i32
    %c0_i32_101 = arith.constant 0 : i32
    %134 = tpu.memref_slice %arg6[%c2_i32_100, %c0_i32_101] : memref<8x32xf32, #tpu.memory_space<vmem>> -> memref<1x32xf32, #tpu.memory_space<vmem>>
    %135 = tpu.memref_slice %arg8[%c2_i32_97] : memref<8x!tpu.dma_semaphore, #tpu.memory_space<semaphore_mem>> -> memref<1x!tpu.dma_semaphore, #tpu.memory_space<semaphore_mem>>
    %136 = tpu.memref_squeeze %135 : memref<1x!tpu.dma_semaphore, #tpu.memory_space<semaphore_mem>> -> memref<!tpu.dma_semaphore, #tpu.memory_space<semaphore_mem>>
    tpu.wait_dma2 semaphore(%136 : memref<!tpu.dma_semaphore, #tpu.memory_space<semaphore_mem>>) src(%133 : memref<1x32xf32, #tpu.memory_space<any>>) dst(%134 : memref<1x32xf32, #tpu.memory_space<vmem>>)
    %c3_i32_102 = arith.constant 3 : i32
    %c0_i32_103 = arith.constant 0 : i32
    %c0_i32_104 = arith.constant 0 : i32
    %137 = tpu.memref_slice %arg3[%c0_i32_103, %c0_i32_104] : memref<64x32xf32, #tpu.memory_space<any>> -> memref<1x32xf32, #tpu.memory_space<any>>
    %c3_i32_105 = arith.constant 3 : i32
    %c0_i32_106 = arith.constant 0 : i32
    %138 = tpu.memref_slice %arg5[%c3_i32_105, %c0_i32_106] : memref<8x32xf32, #tpu.memory_space<vmem>> -> memref<1x32xf32, #tpu.memory_space<vmem>>
    %139 = tpu.memref_slice %arg7[%c3_i32_102] : memref<8x!tpu.dma_semaphore, #tpu.memory_space<semaphore_mem>> -> memref<1x!tpu.dma_semaphore, #tpu.memory_space<semaphore_mem>>
    %140 = tpu.memref_squeeze %139 : memref<1x!tpu.dma_semaphore, #tpu.memory_space<semaphore_mem>> -> memref<!tpu.dma_semaphore, #tpu.memory_space<semaphore_mem>>
    tpu.wait_dma2 semaphore(%140 : memref<!tpu.dma_semaphore, #tpu.memory_space<semaphore_mem>>) src(%137 : memref<1x32xf32, #tpu.memory_space<any>>) dst(%138 : memref<1x32xf32, #tpu.memory_space<vmem>>)
    %c3_i32_107 = arith.constant 3 : i32
    %c0_i32_108 = arith.constant 0 : i32
    %c0_i32_109 = arith.constant 0 : i32
    %141 = tpu.memref_slice %arg4[%c0_i32_108, %c0_i32_109] : memref<64x32xf32, #tpu.memory_space<any>> -> memref<1x32xf32, #tpu.memory_space<any>>
    %c3_i32_110 = arith.constant 3 : i32
    %c0_i32_111 = arith.constant 0 : i32
    %142 = tpu.memref_slice %arg6[%c3_i32_110, %c0_i32_111] : memref<8x32xf32, #tpu.memory_space<vmem>> -> memref<1x32xf32, #tpu.memory_space<vmem>>
    %143 = tpu.memref_slice %arg8[%c3_i32_107] : memref<8x!tpu.dma_semaphore, #tpu.memory_space<semaphore_mem>> -> memref<1x!tpu.dma_semaphore, #tpu.memory_space<semaphore_mem>>
    %144 = tpu.memref_squeeze %143 : memref<1x!tpu.dma_semaphore, #tpu.memory_space<semaphore_mem>> -> memref<!tpu.dma_semaphore, #tpu.memory_space<semaphore_mem>>
    tpu.wait_dma2 semaphore(%144 : memref<!tpu.dma_semaphore, #tpu.memory_space<semaphore_mem>>) src(%141 : memref<1x32xf32, #tpu.memory_space<any>>) dst(%142 : memref<1x32xf32, #tpu.memory_space<vmem>>)
    %c4_i32_112 = arith.constant 4 : i32
    %c0_i32_113 = arith.constant 0 : i32
    %c0_i32_114 = arith.constant 0 : i32
    %145 = tpu.memref_slice %arg3[%c0_i32_113, %c0_i32_114] : memref<64x32xf32, #tpu.memory_space<any>> -> memref<1x32xf32, #tpu.memory_space<any>>
    %c4_i32_115 = arith.constant 4 : i32
    %c0_i32_116 = arith.constant 0 : i32
    %146 = tpu.memref_slice %arg5[%c4_i32_115, %c0_i32_116] : memref<8x32xf32, #tpu.memory_space<vmem>> -> memref<1x32xf32, #tpu.memory_space<vmem>>
    %147 = tpu.memref_slice %arg7[%c4_i32_112] : memref<8x!tpu.dma_semaphore, #tpu.memory_space<semaphore_mem>> -> memref<1x!tpu.dma_semaphore, #tpu.memory_space<semaphore_mem>>
    %148 = tpu.memref_squeeze %147 : memref<1x!tpu.dma_semaphore, #tpu.memory_space<semaphore_mem>> -> memref<!tpu.dma_semaphore, #tpu.memory_space<semaphore_mem>>
    tpu.wait_dma2 semaphore(%148 : memref<!tpu.dma_semaphore, #tpu.memory_space<semaphore_mem>>) src(%145 : memref<1x32xf32, #tpu.memory_space<any>>) dst(%146 : memref<1x32xf32, #tpu.memory_space<vmem>>)
    %c4_i32_117 = arith.constant 4 : i32
    %c0_i32_118 = arith.constant 0 : i32
    %c0_i32_119 = arith.constant 0 : i32
    %149 = tpu.memref_slice %arg4[%c0_i32_118, %c0_i32_119] : memref<64x32xf32, #tpu.memory_space<any>> -> memref<1x32xf32, #tpu.memory_space<any>>
    %c4_i32_120 = arith.constant 4 : i32
    %c0_i32_121 = arith.constant 0 : i32
    %150 = tpu.memref_slice %arg6[%c4_i32_120, %c0_i32_121] : memref<8x32xf32, #tpu.memory_space<vmem>> -> memref<1x32xf32, #tpu.memory_space<vmem>>
    %151 = tpu.memref_slice %arg8[%c4_i32_117] : memref<8x!tpu.dma_semaphore, #tpu.memory_space<semaphore_mem>> -> memref<1x!tpu.dma_semaphore, #tpu.memory_space<semaphore_mem>>
    %152 = tpu.memref_squeeze %151 : memref<1x!tpu.dma_semaphore, #tpu.memory_space<semaphore_mem>> -> memref<!tpu.dma_semaphore, #tpu.memory_space<semaphore_mem>>
    tpu.wait_dma2 semaphore(%152 : memref<!tpu.dma_semaphore, #tpu.memory_space<semaphore_mem>>) src(%149 : memref<1x32xf32, #tpu.memory_space<any>>) dst(%150 : memref<1x32xf32, #tpu.memory_space<vmem>>)
    %c5_i32_122 = arith.constant 5 : i32
    %c0_i32_123 = arith.constant 0 : i32
    %c0_i32_124 = arith.constant 0 : i32
    %153 = tpu.memref_slice %arg3[%c0_i32_123, %c0_i32_124] : memref<64x32xf32, #tpu.memory_space<any>> -> memref<1x32xf32, #tpu.memory_space<any>>
    %c5_i32_125 = arith.constant 5 : i32
    %c0_i32_126 = arith.constant 0 : i32
    %154 = tpu.memref_slice %arg5[%c5_i32_125, %c0_i32_126] : memref<8x32xf32, #tpu.memory_space<vmem>> -> memref<1x32xf32, #tpu.memory_space<vmem>>
    %155 = tpu.memref_slice %arg7[%c5_i32_122] : memref<8x!tpu.dma_semaphore, #tpu.memory_space<semaphore_mem>> -> memref<1x!tpu.dma_semaphore, #tpu.memory_space<semaphore_mem>>
    %156 = tpu.memref_squeeze %155 : memref<1x!tpu.dma_semaphore, #tpu.memory_space<semaphore_mem>> -> memref<!tpu.dma_semaphore, #tpu.memory_space<semaphore_mem>>
    tpu.wait_dma2 semaphore(%156 : memref<!tpu.dma_semaphore, #tpu.memory_space<semaphore_mem>>) src(%153 : memref<1x32xf32, #tpu.memory_space<any>>) dst(%154 : memref<1x32xf32, #tpu.memory_space<vmem>>)
    %c5_i32_127 = arith.constant 5 : i32
    %c0_i32_128 = arith.constant 0 : i32
    %c0_i32_129 = arith.constant 0 : i32
    %157 = tpu.memref_slice %arg4[%c0_i32_128, %c0_i32_129] : memref<64x32xf32, #tpu.memory_space<any>> -> memref<1x32xf32, #tpu.memory_space<any>>
    %c5_i32_130 = arith.constant 5 : i32
    %c0_i32_131 = arith.constant 0 : i32
    %158 = tpu.memref_slice %arg6[%c5_i32_130, %c0_i32_131] : memref<8x32xf32, #tpu.memory_space<vmem>> -> memref<1x32xf32, #tpu.memory_space<vmem>>
    %159 = tpu.memref_slice %arg8[%c5_i32_127] : memref<8x!tpu.dma_semaphore, #tpu.memory_space<semaphore_mem>> -> memref<1x!tpu.dma_semaphore, #tpu.memory_space<semaphore_mem>>
    %160 = tpu.memref_squeeze %159 : memref<1x!tpu.dma_semaphore, #tpu.memory_space<semaphore_mem>> -> memref<!tpu.dma_semaphore, #tpu.memory_space<semaphore_mem>>
    tpu.wait_dma2 semaphore(%160 : memref<!tpu.dma_semaphore, #tpu.memory_space<semaphore_mem>>) src(%157 : memref<1x32xf32, #tpu.memory_space<any>>) dst(%158 : memref<1x32xf32, #tpu.memory_space<vmem>>)
    %c6_i32_132 = arith.constant 6 : i32
    %c0_i32_133 = arith.constant 0 : i32
    %c0_i32_134 = arith.constant 0 : i32
    %161 = tpu.memref_slice %arg3[%c0_i32_133, %c0_i32_134] : memref<64x32xf32, #tpu.memory_space<any>> -> memref<1x32xf32, #tpu.memory_space<any>>
    %c6_i32_135 = arith.constant 6 : i32
    %c0_i32_136 = arith.constant 0 : i32
    %162 = tpu.memref_slice %arg5[%c6_i32_135, %c0_i32_136] : memref<8x32xf32, #tpu.memory_space<vmem>> -> memref<1x32xf32, #tpu.memory_space<vmem>>
    %163 = tpu.memref_slice %arg7[%c6_i32_132] : memref<8x!tpu.dma_semaphore, #tpu.memory_space<semaphore_mem>> -> memref<1x!tpu.dma_semaphore, #tpu.memory_space<semaphore_mem>>
    %164 = tpu.memref_squeeze %163 : memref<1x!tpu.dma_semaphore, #tpu.memory_space<semaphore_mem>> -> memref<!tpu.dma_semaphore, #tpu.memory_space<semaphore_mem>>
    tpu.wait_dma2 semaphore(%164 : memref<!tpu.dma_semaphore, #tpu.memory_space<semaphore_mem>>) src(%161 : memref<1x32xf32, #tpu.memory_space<any>>) dst(%162 : memref<1x32xf32, #tpu.memory_space<vmem>>)
    %c6_i32_137 = arith.constant 6 : i32
    %c0_i32_138 = arith.constant 0 : i32
    %c0_i32_139 = arith.constant 0 : i32
    %165 = tpu.memref_slice %arg4[%c0_i32_138, %c0_i32_139] : memref<64x32xf32, #tpu.memory_space<any>> -> memref<1x32xf32, #tpu.memory_space<any>>
    %c6_i32_140 = arith.constant 6 : i32
    %c0_i32_141 = arith.constant 0 : i32
    %166 = tpu.memref_slice %arg6[%c6_i32_140, %c0_i32_141] : memref<8x32xf32, #tpu.memory_space<vmem>> -> memref<1x32xf32, #tpu.memory_space<vmem>>
    %167 = tpu.memref_slice %arg8[%c6_i32_137] : memref<8x!tpu.dma_semaphore, #tpu.memory_space<semaphore_mem>> -> memref<1x!tpu.dma_semaphore, #tpu.memory_space<semaphore_mem>>
    %168 = tpu.memref_squeeze %167 : memref<1x!tpu.dma_semaphore, #tpu.memory_space<semaphore_mem>> -> memref<!tpu.dma_semaphore, #tpu.memory_space<semaphore_mem>>
    tpu.wait_dma2 semaphore(%168 : memref<!tpu.dma_semaphore, #tpu.memory_space<semaphore_mem>>) src(%165 : memref<1x32xf32, #tpu.memory_space<any>>) dst(%166 : memref<1x32xf32, #tpu.memory_space<vmem>>)
    %c7_i32_142 = arith.constant 7 : i32
    %c0_i32_143 = arith.constant 0 : i32
    %c0_i32_144 = arith.constant 0 : i32
    %169 = tpu.memref_slice %arg3[%c0_i32_143, %c0_i32_144] : memref<64x32xf32, #tpu.memory_space<any>> -> memref<1x32xf32, #tpu.memory_space<any>>
    %c7_i32_145 = arith.constant 7 : i32
    %c0_i32_146 = arith.constant 0 : i32
    %170 = tpu.memref_slice %arg5[%c7_i32_145, %c0_i32_146] : memref<8x32xf32, #tpu.memory_space<vmem>> -> memref<1x32xf32, #tpu.memory_space<vmem>>
    %171 = tpu.memref_slice %arg7[%c7_i32_142] : memref<8x!tpu.dma_semaphore, #tpu.memory_space<semaphore_mem>> -> memref<1x!tpu.dma_semaphore, #tpu.memory_space<semaphore_mem>>
    %172 = tpu.memref_squeeze %171 : memref<1x!tpu.dma_semaphore, #tpu.memory_space<semaphore_mem>> -> memref<!tpu.dma_semaphore, #tpu.memory_space<semaphore_mem>>
    tpu.wait_dma2 semaphore(%172 : memref<!tpu.dma_semaphore, #tpu.memory_space<semaphore_mem>>) src(%169 : memref<1x32xf32, #tpu.memory_space<any>>) dst(%170 : memref<1x32xf32, #tpu.memory_space<vmem>>)
    %c7_i32_147 = arith.constant 7 : i32
    %c0_i32_148 = arith.constant 0 : i32
    %c0_i32_149 = arith.constant 0 : i32
    %173 = tpu.memref_slice %arg4[%c0_i32_148, %c0_i32_149] : memref<64x32xf32, #tpu.memory_space<any>> -> memref<1x32xf32, #tpu.memory_space<any>>
    %c7_i32_150 = arith.constant 7 : i32
    %c0_i32_151 = arith.constant 0 : i32
    %174 = tpu.memref_slice %arg6[%c7_i32_150, %c0_i32_151] : memref<8x32xf32, #tpu.memory_space<vmem>> -> memref<1x32xf32, #tpu.memory_space<vmem>>
    %175 = tpu.memref_slice %arg8[%c7_i32_147] : memref<8x!tpu.dma_semaphore, #tpu.memory_space<semaphore_mem>> -> memref<1x!tpu.dma_semaphore, #tpu.memory_space<semaphore_mem>>
    %176 = tpu.memref_squeeze %175 : memref<1x!tpu.dma_semaphore, #tpu.memory_space<semaphore_mem>> -> memref<!tpu.dma_semaphore, #tpu.memory_space<semaphore_mem>>
    tpu.wait_dma2 semaphore(%176 : memref<!tpu.dma_semaphore, #tpu.memory_space<semaphore_mem>>) src(%173 : memref<1x32xf32, #tpu.memory_space<any>>) dst(%174 : memref<1x32xf32, #tpu.memory_space<vmem>>)
    return
  }
  func.func @transform_2(%arg0: i32, %arg1: memref<8xi32, #tpu.memory_space<smem>>, %arg2: memref<8xi32, #tpu.memory_space<smem>>) -> (i32, i32) {
    %c0_i32 = arith.constant 0 : i32
    %c0_i32_0 = arith.constant 0 : i32
    return %arg0, %c0_i32 : i32, i32
  }
  func.func @transform_3(%arg0: i32, %arg1: memref<8xi32, #tpu.memory_space<smem>>, %arg2: memref<8xi32, #tpu.memory_space<smem>>) -> (i32, i32) {
    %c0_i32 = arith.constant 0 : i32
    %c0_i32_0 = arith.constant 0 : i32
    return %arg0, %c0_i32 : i32, i32
  }
}

</mosaic_0001>

<bundles_post_ra>
// kernel: tpu_custom_call.1
= control target key start
LH: loop header
LB: loop body
LE: loop exit
PB: predicated region body
PF: predicated region fallthrough
CT: control target
= control target key end

     0   :  { %s1408_s0 = inlined_call_operand.vmem [shape: s32[8], index: 0, kind: input, shape index: {}]   ;;  %s1409_s2 = inlined_call_operand.vmem [shape: f32[64,32], index: 2, kind: input, shape index: {}]   ;;  %s1410_s3 = inlined_call_operand.vmem [shape: f32[64,32], index: 3, kind: input, shape index: {}]   ;;  %s1411_s4 = inlined_call_operand.hbm [shape: f32[8,32], index: 4, kind: output, shape index: {0}]   ;;  %s1412_s5 = inlined_call_operand.hbm [shape: f32[8,32], index: 5, kind: output, shape index: {1}]   ;;  %s1413_s1 = inlined_call_operand.vmem [shape: s32[8], index: 1, kind: input, shape index: {}]  }
   0x1   :  { %s11_s20 = sshll.u32 %s1408_s0, 4  ;;  %s15_s23 = sshll.u32 %s1413_s1, 4  ;;  %s12_s20 = int_to_ptr.vmem [resolvable:$true] %s11_s20  ;;  %s16_s23 = int_to_ptr.vmem [resolvable:$true] %s15_s23 }
   0x2   :  { %s1190_s24 = scalar_lea.vmem %s12_s20, 16  ;;  %p1195_p1 = scmp.lt.s32.totalorder %s12_s20, %s12_s20 }
   0x3   :  { %p1191_p0 = scmp.ne.s32.totalorder %s12_s20, %s1190_s24  ;;  %p1196_p2 = scmp.lt.s32.totalorder %s1190_s24, %s1190_s24 }
   0x5   :  { %p1197_p3 = por %p1196_p2, %p1195_p1 }
   0x7   :  { %p1198_p4 = pnand %p1197_p3, %p1191_p0 }
   0x9   :  { %1201 = shalt.err (!%p1198_p4)  }
   0xa   :  { %s1296_s25 = smov [#allocation5]   ;;  %s1202_s26 = scalar_lea.vmem %s16_s23, 16 }
   0xb   :  { %14 = dma.vmem_to_smem %s12_s20, 16, %s1296_s25, [#allocation4] }
   0xc   :  { %p1203_p5 = scmp.ne.s32.totalorder %s16_s23, %s1202_s26  ;;  %p1207_p6 = scmp.lt.s32.totalorder %s16_s23, %s16_s23 }
   0xd   :  { %p1208_p7 = scmp.lt.s32.totalorder %s1202_s26, %s1202_s26 }
   0xf   :  { %p1209_p8 = por %p1208_p7, %p1207_p6 }
  0x11   :  { %p1210_p9 = pnand %p1209_p8, %p1203_p5 }
  0x13   :  { %1213 = shalt.err (!%p1210_p9)  }
  0x14   :  { %s1297_s0 = smov [#allocation6]  }
  0x15   :  { %18 = dma.vmem_to_smem %s16_s23, 16, %s1297_s0, [#allocation4] }
  0x16   :  { %1258 = dma.done.wait [#allocation4], 32 }
  0x17   :  { %1259 = vsyncadd [#allocation4], 4294967264 }
  0x18   :  { %20 = sfence }
  0x19   :  { %21 = vsyncpa [#allocation8], 0 }
  0x1a   :  { %22 = vsyncpa [#allocation10], 0  ;;  %s24_s1 = sld [smem:[#allocation5]] }
  0x1b   :  { %s25_s27 = sld [smem:[#allocation6]] }
  0x20   :  { %s26_s30 = scalar_lea.vmem %s1409_s2, %s24_s1 }
  0x21   :  { %v44_v0 = vld [vmem:[%s26_s30] sm:$0x1] }
  0x22   :  { %45 = vst [vmem:[#allocation7] sm:$0x1] %v44_v0 }
  0x23   :  { %70 = vsyncadd [#allocation2], 16  ;;  %s71_s8 = scalar_lea.vmem %s1410_s3, %s25_s27 }
  0x24   :  { %v89_v1 = vld [vmem:[%s71_s8] sm:$0x1] }
  0x25   :  { %90 = vst [vmem:[#allocation9] sm:$0x1] %v89_v1 }
  0x26   :  { %115 = vsyncadd [#allocation3], 16  ;;  %s1156_s9 = sld [smem:[#allocation5 + $0x1]] }
  0x27   :  { %s1157_s10 = sld [smem:[#allocation6 + $0x1]] }
  0x2c   :  { %s119_s13 = scalar_lea.vmem %s1409_s2, %s1156_s9 }
  0x2d   :  { %v139_v2 = vld [vmem:[%s119_s13] sm:$0x1] }
  0x2e   :  { %140 = vst [vmem:[#allocation7 + $0x1] sm:$0x1] %v139_v2 }
  0x2f   :  { %165 = vsyncadd [#allocation2 + $0x1], 16  ;;  %s166_s16 = scalar_lea.vmem %s1410_s3, %s1157_s10 }
  0x30   :  { %v186_v3 = vld [vmem:[%s166_s16] sm:$0x1] }
  0x31   :  { %187 = vst [vmem:[#allocation9 + $0x1] sm:$0x1] %v186_v3 }
  0x32   :  { %212 = vsyncadd [#allocation3 + $0x1], 16  ;;  %s1158_s17 = sld [smem:[#allocation5 + $0x2]] }
  0x33   :  { %s1159_s18 = sld [smem:[#allocation6 + $0x2]] }
  0x38   :  { %s216_s21 = scalar_lea.vmem %s1409_s2, %s1158_s17 }
  0x39   :  { %v236_v4 = vld [vmem:[%s216_s21] sm:$0x1] }
  0x3a   :  { %237 = vst [vmem:[#allocation7 + $0x2] sm:$0x1] %v236_v4 }
  0x3b   :  { %262 = vsyncadd [#allocation2 + $0x2], 16  ;;  %s263_s24 = scalar_lea.vmem %s1410_s3, %s1159_s18 }
  0x3c   :  { %v283_v5 = vld [vmem:[%s263_s24] sm:$0x1] }
  0x3d   :  { %284 = vst [vmem:[#allocation9 + $0x2] sm:$0x1] %v283_v5 }
  0x3e   :  { %309 = vsyncadd [#allocation3 + $0x2], 16  ;;  %s1160_s25 = sld [smem:[#allocation5 + $0x3]] }
  0x3f   :  { %s1161_s26 = sld [smem:[#allocation6 + $0x3]] }
  0x44   :  { %s313_s27 = scalar_lea.vmem %s1409_s2, %s1160_s25 }
  0x45   :  { %v333_v6 = vld [vmem:[%s313_s27] sm:$0x1] }
  0x46   :  { %334 = vst [vmem:[#allocation7 + $0x3] sm:$0x1] %v333_v6 }
  0x47   :  { %359 = vsyncadd [#allocation2 + $0x3], 16  ;;  %s360_s30 = scalar_lea.vmem %s1410_s3, %s1161_s26 }
  0x48   :  { %v380_v7 = vld [vmem:[%s360_s30] sm:$0x1] }
  0x49   :  { %381 = vst [vmem:[#allocation9 + $0x3] sm:$0x1] %v380_v7 }
  0x4a   :  { %406 = vsyncadd [#allocation3 + $0x3], 16  ;;  %s1162_s6 = sld [smem:[#allocation5 + $0x4]] }
  0x4b   :  { %s1163_s7 = sld [smem:[#allocation6 + $0x4]] }
  0x50   :  { %s410_s10 = scalar_lea.vmem %s1409_s2, %s1162_s6 }
  0x51   :  { %v430_v8 = vld [vmem:[%s410_s10] sm:$0x1] }
  0x52   :  { %431 = vst [vmem:[#allocation7 + $0x4] sm:$0x1] %v430_v8 }
  0x53   :  { %456 = vsyncadd [#allocation2 + $0x4], 16  ;;  %s457_s13 = scalar_lea.vmem %s1410_s3, %s1163_s7 }
  0x54   :  { %v477_v9 = vld [vmem:[%s457_s13] sm:$0x1] }
  0x55   :  { %478 = vst [vmem:[#allocation9 + $0x4] sm:$0x1] %v477_v9 }
  0x56   :  { %503 = vsyncadd [#allocation3 + $0x4], 16  ;;  %s1164_s14 = sld [smem:[#allocation5 + $0x5]] }
  0x57   :  { %s1165_s15 = sld [smem:[#allocation6 + $0x5]] }
  0x5c   :  { %s507_s18 = scalar_lea.vmem %s1409_s2, %s1164_s14 }
  0x5d   :  { %v527_v10 = vld [vmem:[%s507_s18] sm:$0x1] }
  0x5e   :  { %528 = vst [vmem:[#allocation7 + $0x5] sm:$0x1] %v527_v10 }
  0x5f   :  { %553 = vsyncadd [#allocation2 + $0x5], 16  ;;  %s554_s21 = scalar_lea.vmem %s1410_s3, %s1165_s15 }
  0x60   :  { %v574_v11 = vld [vmem:[%s554_s21] sm:$0x1] }
  0x61   :  { %575 = vst [vmem:[#allocation9 + $0x5] sm:$0x1] %v574_v11 }
  0x62   :  { %600 = vsyncadd [#allocation3 + $0x5], 16  ;;  %s1166_s22 = sld [smem:[#allocation5 + $0x6]] }
  0x63   :  { %s1167_s23 = sld [smem:[#allocation6 + $0x6]] }
  0x68   :  { %s604_s26 = scalar_lea.vmem %s1409_s2, %s1166_s22 }
  0x69   :  { %v624_v12 = vld [vmem:[%s604_s26] sm:$0x1] }
  0x6a   :  { %625 = vst [vmem:[#allocation7 + $0x6] sm:$0x1] %v624_v12 }
  0x6b   :  { %650 = vsyncadd [#allocation2 + $0x6], 16  ;;  %s651_s27 = scalar_lea.vmem %s1410_s3, %s1167_s23 }
  0x6c   :  { %v671_v13 = vld [vmem:[%s651_s27] sm:$0x1] }
  0x6d   :  { %672 = vst [vmem:[#allocation9 + $0x6] sm:$0x1] %v671_v13 }
  0x6e   :  { %697 = vsyncadd [#allocation3 + $0x6], 16  ;;  %s1168_s28 = sld [smem:[#allocation5 + $0x7]] }
  0x6f   :  { %s1169_s29 = sld [smem:[#allocation6 + $0x7]] }
  0x74   :  { %s701_s7 = scalar_lea.vmem %s1409_s2, %s1168_s28 }
  0x75   :  { %v721_v14 = vld [vmem:[%s701_s7] sm:$0x1] }
  0x76   :  { %722 = vst [vmem:[#allocation7 + $0x7] sm:$0x1] %v721_v14 }
  0x77   :  { %747 = vsyncadd [#allocation2 + $0x7], 16  ;;  %s748_s10 = scalar_lea.vmem %s1410_s3, %s1169_s29 }
  0x78   :  { %v768_v15 = vld [vmem:[%s748_s10] sm:$0x1] }
  0x79   :  { %769 = vst [vmem:[#allocation9 + $0x7] sm:$0x1] %v768_v15 }
  0x7a   :  { %794 = vsyncadd [#allocation3 + $0x7], 16 }
  0x7b   :  { %1260 = dma.done.wait [#allocation2], 16 }
  0x7c   :  { %1261 = vsyncadd [#allocation2], 4294967280 }
  0x7d   :  { %1262 = dma.done.wait [#allocation3], 16 }
  0x7e   :  { %1263 = vsyncadd [#allocation3], 4294967280 }
  0x7f   :  { %1264 = dma.done.wait [#allocation2 + $0x1], 16 }
  0x80   :  { %1265 = vsyncadd [#allocation2 + $0x1], 4294967280 }
  0x81   :  { %1266 = dma.done.wait [#allocation3 + $0x1], 16 }
  0x82   :  { %1267 = vsyncadd [#allocation3 + $0x1], 4294967280 }
  0x83   :  { %1268 = dma.done.wait [#allocation2 + $0x2], 16 }
  0x84   :  { %1269 = vsyncadd [#allocation2 + $0x2], 4294967280 }
  0x85   :  { %1270 = dma.done.wait [#allocation3 + $0x2], 16 }
  0x86   :  { %1271 = vsyncadd [#allocation3 + $0x2], 4294967280 }
  0x87   :  { %1272 = dma.done.wait [#allocation2 + $0x3], 16 }
  0x88   :  { %1273 = vsyncadd [#allocation2 + $0x3], 4294967280 }
  0x89   :  { %1274 = dma.done.wait [#allocation3 + $0x3], 16 }
  0x8a   :  { %1275 = vsyncadd [#allocation3 + $0x3], 4294967280 }
  0x8b   :  { %1276 = dma.done.wait [#allocation2 + $0x4], 16 }
  0x8c   :  { %1277 = vsyncadd [#allocation2 + $0x4], 4294967280 }
  0x8d   :  { %1278 = dma.done.wait [#allocation3 + $0x4], 16 }
  0x8e   :  { %1279 = vsyncadd [#allocation3 + $0x4], 4294967280 }
  0x8f   :  { %1280 = dma.done.wait [#allocation2 + $0x5], 16 }
  0x90   :  { %1281 = vsyncadd [#allocation2 + $0x5], 4294967280 }
  0x91   :  { %1282 = dma.done.wait [#allocation3 + $0x5], 16 }
  0x92   :  { %1283 = vsyncadd [#allocation3 + $0x5], 4294967280 }
  0x93   :  { %1284 = dma.done.wait [#allocation2 + $0x6], 16 }
  0x94   :  { %1285 = vsyncadd [#allocation2 + $0x6], 4294967280 }
  0x95   :  { %1286 = dma.done.wait [#allocation3 + $0x6], 16 }
  0x96   :  { %1287 = vsyncadd [#allocation3 + $0x6], 4294967280 }
  0x97   :  { %1288 = dma.done.wait [#allocation2 + $0x7], 16 }
  0x98   :  { %1289 = vsyncadd [#allocation2 + $0x7], 4294967280 }
  0x99   :  { %1290 = dma.done.wait [#allocation3 + $0x7], 16 }
  0x9a   :  { %1291 = vsyncadd [#allocation3 + $0x7], 4294967280  ;;  %s1298_s2 = smov [#allocation7]   ;;  %s1299_s11 = smov [#allocation9]  }
  0x9b   :  { %s834_s3 = sshll.u32 %s1298_s2, 4  ;;  %s844_s12 = sshll.u32 %s1299_s11, 4  ;;  %s835_s3 = int_to_ptr.vmem [resolvable:$true] %s834_s3  ;;  %s845_s12 = int_to_ptr.vmem [resolvable:$true] %s844_s12 }
  0x9c   :  { %s1214_s13 = scalar_lea.vmem %s835_s3, 128  ;;  %p1219_p11 = scmp.lt.s32.totalorder %s835_s3, %s835_s3 }
  0x9d   :  { %p1215_p10 = scmp.ne.s32.totalorder %s835_s3, %s1214_s13  ;;  %p1220_p12 = scmp.lt.s32.totalorder %s1214_s13, %s1214_s13 }
  0x9f   :  { %p1221_p13 = por %p1220_p12, %p1219_p11 }
  0xa1   :  { %p1222_p0 = pnand %p1221_p13, %p1215_p10 }
  0xa3   :  { %1225 = shalt.err (!%p1222_p0)
}
  0xa4   :  { %s1226_s16 = scalar_lea.hbm %s1411_s4, 128 }
  0xa5   :  { %p1227_p1 = scmp.ne.s32.totalorder %s1411_s4, %s1226_s16  ;;  %p1230_p2 = scmp.lt.u32.totalorder %s1226_s16, %s1411_s4 }
  0xa7   :  { %p1232_p3 = pnand %p1230_p2, %p1227_p1 }
  0xa9   :  { %1235 = shalt.err (!%p1232_p3)
}
  0xaa   :  { %837 = dma.vmem_to_hbm [thread:$0]  %s835_s3, 128, %s1411_s4, [#allocation8]  }
  0xab   :  { %s1236_s23 = scalar_lea.vmem %s845_s12, 128  ;;  %p1241_p5 = scmp.lt.s32.totalorder %s845_s12, %s845_s12 }
  0xac   :  { %p1237_p4 = scmp.ne.s32.totalorder %s845_s12, %s1236_s23  ;;  %p1242_p6 = scmp.lt.s32.totalorder %s1236_s23, %s1236_s23 }
  0xae   :  { %p1243_p7 = por %p1242_p6, %p1241_p5 }
  0xb0   :  { %p1244_p8 = pnand %p1243_p7, %p1237_p4 }
  0xb2   :  { %1247 = shalt.err (!%p1244_p8)
}
  0xb3   :  { %s1248_s26 = scalar_lea.hbm %s1412_s5, 128 }
  0xb4   :  { %p1249_p9 = scmp.ne.s32.totalorder %s1412_s5, %s1248_s26  ;;  %p1252_p10 = scmp.lt.u32.totalorder %s1248_s26, %s1412_s5 }
  0xb6   :  { %p1254_p11 = pnand %p1252_p10, %p1249_p9 }
  0xb8   :  { %1257 = shalt.err (!%p1254_p11)
}
  0xb9   :  { %847 = dma.vmem_to_hbm [thread:$0]  %s845_s12, 128, %s1412_s5, [#allocation10]  }
  0xba   :  { %1292 = dma.done.wait [#allocation8], 128  }
  0xbb   :  { %1293 = vsyncadd [#allocation8], 4294967168 }
  0xbc   :  { %1294 = dma.done.wait [#allocation10], 128  }
  0xbd   :  { %1295 = vsyncadd [#allocation10], 4294967168 }
  0xbe   :  { %854 = vsyncpa [#allocation8], 1 }
  0xbf   :  { %855 = vsyncpa [#allocation10], 1 }
  0xc0   :  { %856 = vsyncmov [#allocation2] }
  0xc3   :  { %s857_s30 = vpop.sfrf %856 }
  0xc4   :  { %p1170_p12 = scmp.ne.s32.totalorder %s857_s30, 0 }
  0xc6   :  { %861 = shalt.err (%p1170_p12)  }
  0xc7   :  { %863 = vsyncmov [#allocation2 + $0x1] }
  0xca   :  { %s864_s6 = vpop.sfrf %863 }
  0xcb   :  { %p1171_p13 = scmp.ne.s32.totalorder %s864_s6, 0 }
  0xcd   :  { %868 = shalt.err (%p1171_p13)  }
  0xce   :  { %870 = vsyncmov [#allocation2 + $0x2] }
  0xd1   :  { %s871_s7 = vpop.sfrf %870 }
  0xd2   :  { %p1172_p0 = scmp.ne.s32.totalorder %s871_s7, 0 }
  0xd4   :  { %875 = shalt.err (%p1172_p0)  }
  0xd5   :  { %877 = vsyncmov [#allocation2 + $0x3] }
  0xd8   :  { %s878_s5 = vpop.sfrf %877 }
  0xd9   :  { %p1173_p1 = scmp.ne.s32.totalorder %s878_s5, 0 }
  0xdb   :  { %882 = shalt.err (%p1173_p1)  }
  0xdc   :  { %884 = vsyncmov [#allocation2 + $0x4] }
  0xdf   :  { %s885_s8 = vpop.sfrf %884 }
  0xe0   :  { %p1174_p2 = scmp.ne.s32.totalorder %s885_s8, 0 }
  0xe2   :  { %889 = shalt.err (%p1174_p2)  }
  0xe3   :  { %891 = vsyncmov [#allocation2 + $0x5] }
  0xe6   :  { %s892_s9 = vpop.sfrf %891 }
  0xe7   :  { %p1175_p3 = scmp.ne.s32.totalorder %s892_s9, 0 }
  0xe9   :  { %896 = shalt.err (%p1175_p3)  }
  0xea   :  { %898 = vsyncmov [#allocation2 + $0x6] }
  0xed   :  { %s899_s10 = vpop.sfrf %898 }
  0xee   :  { %p1176_p4 = scmp.ne.s32.totalorder %s899_s10, 0 }
  0xf0   :  { %903 = shalt.err (%p1176_p4)  }
  0xf1   :  { %905 = vsyncmov [#allocation2 + $0x7] }
  0xf4   :  { %s906_s2 = vpop.sfrf %905 }
  0xf5   :  { %p1177_p5 = scmp.ne.s32.totalorder %s906_s2, 0 }
  0xf7   :  { %910 = shalt.err (%p1177_p5)  }
  0xf8   :  { %911 = vsyncmov [#allocation3] }
  0xfb   :  { %s912_s3 = vpop.sfrf %911 }
  0xfc   :  { %p1178_p6 = scmp.ne.s32.totalorder %s912_s3, 0 }
  0xfe   :  { %916 = shalt.err (%p1178_p6)  }
  0xff   :  { %918 = vsyncmov [#allocation3 + $0x1] }
 0x102   :  { %s919_s11 = vpop.sfrf %918 }
 0x103   :  { %p1179_p7 = scmp.ne.s32.totalorder %s919_s11, 0 }
 0x105   :  { %923 = shalt.err (%p1179_p7)  }
 0x106   :  { %925 = vsyncmov [#allocation3 + $0x2] }
 0x109   :  { %s926_s12 = vpop.sfrf %925 }
 0x10a   :  { %p1180_p8 = scmp.ne.s32.totalorder %s926_s12, 0 }
 0x10c   :  { %930 = shalt.err (%p1180_p8)  }
 0x10d   :  { %932 = vsyncmov [#allocation3 + $0x3] }
 0x110   :  { %s933_s13 = vpop.sfrf %932 }
 0x111   :  { %p1181_p9 = scmp.ne.s32.totalorder %s933_s13, 0 }
 0x113   :  { %937 = shalt.err (%p1181_p9)  }
 0x114   :  { %939 = vsyncmov [#allocation3 + $0x4] }
 0x117   :  { %s940_s14 = vpop.sfrf %939 }
 0x118   :  { %p1182_p10 = scmp.ne.s32.totalorder %s940_s14, 0 }
 0x11a   :  { %944 = shalt.err (%p1182_p10)  }
 0x11b   :  { %946 = vsyncmov [#allocation3 + $0x5] }
 0x11e   :  { %s947_s15 = vpop.sfrf %946 }
 0x11f   :  { %p1183_p11 = scmp.ne.s32.totalorder %s947_s15, 0 }
 0x121   :  { %951 = shalt.err (%p1183_p11)  }
 0x122   :  { %953 = vsyncmov [#allocation3 + $0x6] }
 0x125   :  { %s954_s16 = vpop.sfrf %953 }
 0x126   :  { %p1184_p12 = scmp.ne.s32.totalorder %s954_s16, 0 }
 0x128   :  { %958 = shalt.err (%p1184_p12)  }
 0x129   :  { %960 = vsyncmov [#allocation3 + $0x7] }
 0x12c   :  { %s961_s17 = vpop.sfrf %960 }
 0x12d   :  { %p1185_p13 = scmp.ne.s32.totalorder %s961_s17, 0 }
 0x12f   :  { %965 = shalt.err (%p1185_p13)  }

</bundles_post_ra>
